<compile_context>
chip_gen: v5e
topology: v5e:2x2
jax: 0.10.0
libtpu: 0.0.40
codegen_flags: <defaults>
</compile_context>

<pallas_src>
import functools
import math

import jax
import jax.numpy as jnp
from jax.experimental import pallas as pl
from jax.experimental.pallas import tpu as pltpu


def _round_up(x: int, m: int) -> int:
    return ((x + m - 1) // m) * m


def _make_action_kernel(mode: str, use_bf16: bool):
    """Kernel body statically specialized to one inference mode."""
    mm_dtype = jnp.bfloat16 if use_bf16 else jnp.float32

    def _mm(a, b):
        # MXU matmul: (optionally) bf16 operands, always f32 accumulation.
        return jnp.dot(a.astype(mm_dtype), b.astype(mm_dtype),
                       preferred_element_type=jnp.float32)

    if mode == "deterministic":
        def kernel(mu_ref, wT_ref, bias_ref, mu_out_ref):
            mu_s = _mm(mu_ref[...], wT_ref[...]) + bias_ref[...]
            mu_out_ref[...] = mu_s.astype(mu_out_ref.dtype)
        return kernel

    if mode == "exogenous":
        # gamma_S rows are all identical: |b_noise| @ |W|^T precomputed in the
        # wrapper as a [1, O] row -> broadcast store, no gamma matmul at all.
        def kernel(mu_ref, wT_ref, bias_ref, grow_ref, mu_out_ref, gamma_out_ref):
            mu_s = _mm(mu_ref[...], wT_ref[...]) + bias_ref[...]
            mu_out_ref[...] = mu_s.astype(mu_out_ref.dtype)
            gamma_out_ref[...] = jnp.broadcast_to(
                grow_ref[...], gamma_out_ref.shape).astype(gamma_out_ref.dtype)
        return kernel

    if mode == "endogenous":
        def kernel(mu_ref, gamma_ref, wT_ref, bias_ref, mu_out_ref, gamma_out_ref):
            wT = wT_ref[...]
            mu_s = _mm(mu_ref[...], wT) + bias_ref[...]
            gamma_s = _mm(gamma_ref[...], jnp.abs(wT))      # |W|^T in-kernel
            mu_out_ref[...] = mu_s.astype(mu_out_ref.dtype)
            gamma_out_ref[...] = gamma_s.astype(gamma_out_ref.dtype)
        return kernel

    if mode == "standard":
        # (gamma + |b_noise|) @ |W|^T == gamma @ |W|^T + (|b_noise| @ |W|^T);
        # the second term is a precomputed [1, O] row -> cheap broadcast add.
        def kernel(mu_ref, gamma_ref, wT_ref, bias_ref, grow_ref,
                   mu_out_ref, gamma_out_ref):
            wT = wT_ref[...]
            mu_s = _mm(mu_ref[...], wT) + bias_ref[...]
            gamma_s = _mm(gamma_ref[...], jnp.abs(wT)) + grow_ref[...]
            mu_out_ref[...] = mu_s.astype(mu_out_ref.dtype)
            gamma_out_ref[...] = gamma_s.astype(gamma_out_ref.dtype)
        return kernel

    if mode == "sampling":
        def kernel(mu_ref, gamma_ref, u_ref, wT_ref, bias_ref, bnoise_ref,
                   mu_out_ref, gamma_out_ref):
            wT = wT_ref[...]
            eps = jnp.tan(jnp.pi * (u_ref[...] - 0.5))          # f32 mode math
            mu_f = mu_ref[...] + bnoise_ref[...] * eps
            mu_s = _mm(mu_f, wT) + bias_ref[...]
            gamma_s = _mm(gamma_ref[...], jnp.abs(wT))
            mu_out_ref[...] = mu_s.astype(mu_out_ref.dtype)
            gamma_out_ref[...] = gamma_s.astype(gamma_out_ref.dtype)
        return kernel

    raise ValueError(f"Unknown mode: {mode}")


@functools.partial(jax.jit, static_argnames=("mode", "use_bf16_matmul"))
def action_forward(mu_U, gamma_U, weight, bias, b_noise, mode="standard",
                   uniform=None, use_bf16_matmul=False):
    """Pallas-backed forward of the Action module.

    mu_U, gamma_U : [B, C] float (f32 or bf16)
    weight        : [O, C] float32  (PyTorch layout)
    bias          : [O]    float32
    b_noise       : [C]    float32
    uniform       : [B, C] float32 in [0,1); required only for mode='sampling'
    """
    if mode not in ("deterministic", "exogenous", "endogenous", "standard",
                    "sampling"):
        raise ValueError(f"Unknown mode: {mode}")
    if mode == "sampling" and uniform is None:
        raise ValueError("mode='sampling' requires a `uniform` array")

    f32 = jnp.float32
    hi = jax.lax.Precision.HIGHEST
    B, C = mu_U.shape
    O = weight.shape[0]

    mm_dtype = jnp.bfloat16 if use_bf16_matmul else f32
    wt_item = 2 if use_bf16_matmul else 4
    act_item = 2 if use_bf16_matmul else 4

    n_out = 1 if mode == "deterministic" else 2

    # Per-mode activation operands & their HBM itemsizes (sampling keeps the
    # noise-math inputs mu / uniform in f32 for precision of tan/adds).
    if mode in ("deterministic", "exogenous"):
        act_items = (act_item,)
    elif mode in ("endogenous", "standard"):
        act_items = (act_item, act_item)
    else:  # sampling: mu(f32), gamma(mm), uniform(f32)
        act_items = (4, act_item, 4)

    # ---- generation-aware tile size & VMEM budget -------------------------
    try:
        vmem_cap = int(getattr(pltpu.get_tpu_info(), "vmem_capacity_bytes",
                               64 << 20))
    except Exception:                       # interpret mode / older runtimes
        vmem_cap = 64 << 20                 # conservative (v7x-sized)
    big_vmem = vmem_cap >= (100 << 20)      # v5e / v6e: 128 MiB per core
    act_gate = (40 << 20) if big_vmem else (16 << 20)
    vmem_hard_cap = (96 << 20) if big_vmem else (48 << 20)   # headroom on v7x
    tb_cap = 1024 if big_vmem else 256

    weight_bytes = 2 * C * O * wt_item      # conservatively double-buffered
    row_bytes = 2 * (2 * C + 3 * O) * 4     # bias / grow / b_noise rows

    def _step_bytes(tb):                    # double-buffered per-step footprint
        ins = sum(2 * tb * C * it for it in act_items)
        outs = n_out * 2 * tb * O * 4
        return ins + outs + weight_bytes + row_bytes

    TB = min(_round_up(B, 8), tb_cap)
    while TB > 64 and _step_bytes(TB) > act_gate:
        TB = max(64, _round_up(TB // 2, 8))
    grid = (pl.cdiv(B, TB),)                # partial last block masked by Pallas

    vmem_limit = int(min(max(_step_bytes(TB) + (4 << 20), 32 << 20),
                         vmem_hard_cap))

    # ---- operands (weights prepared once; no batch padding, no out slicing)
    w32 = weight.astype(f32)
    wT = w32.T.astype(mm_dtype)                         # [C, O], cast once
    bias_row = bias.astype(f32).reshape(1, O)

    # If callers already hold bf16 activations these casts are no-ops.
    mu_in = mu_U.astype(f32 if mode == "sampling" else mm_dtype)

    # ---- BlockSpecs --------------------------------------------------------
    act_spec_c = pl.BlockSpec((TB, C), lambda b: (b, 0))   # batch-tiled acts
    out_spec_o = pl.BlockSpec((TB, O), lambda b: (b, 0))   # batch-tiled outs

    single_buffer_w = weight_bytes > (8 << 20)   # only bother for big weights

    def _stationary(shape, single=False):
        idx = lambda b: (0, 0)
        if single:
            try:   # constant index_map -> one DMA; one buffer is enough
                return pl.BlockSpec(shape, idx, pipeline_mode=pl.Buffered(1))
            except Exception:
                pass
        return pl.BlockSpec(shape, idx)

    w_spec = _stationary((C, O), single=single_buffer_w)
    bias_spec = _stationary((1, O))
    grow_spec = _stationary((1, O))
    bn_spec = _stationary((1, C))

    if mode == "deterministic":
        operands = (mu_in, wT, bias_row)
        in_specs = [act_spec_c, w_spec, bias_spec]
        flops = 2 * B * C * O
    elif mode == "exogenous":
        grow = jnp.matmul(jnp.abs(b_noise.astype(f32)).reshape(1, C),
                          jnp.abs(w32).T, precision=hi)             # [1, O]
        operands = (mu_in, wT, bias_row, grow)
        in_specs = [act_spec_c, w_spec, bias_spec, grow_spec]
        flops = 2 * B * C * O
    elif mode == "endogenous":
        gamma_in = gamma_U.astype(mm_dtype)
        operands = (mu_in, gamma_in, wT, bias_row)
        in_specs = [act_spec_c, act_spec_c, w_spec, bias_spec]
        flops = 4 * B * C * O
    elif mode == "standard":
        gamma_in = gamma_U.astype(mm_dtype)
        grow = jnp.matmul(jnp.abs(b_noise.astype(f32)).reshape(1, C),
                          jnp.abs(w32).T, precision=hi)             # [1, O]
        operands = (mu_in, gamma_in, wT, bias_row, grow)
        in_specs = [act_spec_c, act_spec_c, w_spec, bias_spec, grow_spec]
        flops = 4 * B * C * O
    else:  # sampling
        gamma_in = gamma_U.astype(mm_dtype)
        u_in = uniform.astype(f32)
        bn_row = b_noise.astype(f32).reshape(1, C)
        operands = (mu_in, gamma_in, u_in, wT, bias_row, bn_row)
        in_specs = [act_spec_c, act_spec_c, act_spec_c, w_spec, bias_spec,
                    bn_spec]
        flops = 4 * B * C * O

    out_shapes = tuple(jax.ShapeDtypeStruct((B, O), f32) for _ in range(n_out))
    out_specs = tuple(out_spec_o for _ in range(n_out))
    if n_out == 1:
        out_shapes, out_specs = out_shapes[0], out_specs[0]

    bytes_accessed = (sum(int(a.size) * a.dtype.itemsize for a in operands)
                      + n_out * B * O * 4)
    cost = pl.CostEstimate(
        flops=flops,
        transcendentals=(B * C if mode == "sampling" else 0),
        bytes_accessed=bytes_accessed,
    )

    kernel = _make_action_kernel(mode, use_bf16_matmul)
    results = pl.pallas_call(
        kernel,
        grid=grid,
        in_specs=in_specs,
        out_specs=out_specs,
        out_shape=out_shapes,
        compiler_params=pltpu.CompilerParams(
            dimension_semantics=("parallel",),
            vmem_limit_bytes=vmem_limit,
        ),
        cost_estimate=cost,
    )(*operands)

    if n_out == 1:
        return results
    return results[0], results[1]


def _reference_forward(mu_U, gamma_U, weight, bias, b_noise, mode, uniform=None):
    """Pure-JAX reference mirroring the PyTorch semantics (f32 matmuls)."""
    hi = jax.lax.Precision.HIGHEST
    if mode == "deterministic":
        mu_f, gamma_f = mu_U, None
    elif mode == "exogenous":
        mu_f = mu_U
        gamma_f = jnp.broadcast_to(jnp.abs(b_noise)[None, :], gamma_U.shape)
    elif mode == "endogenous":
        mu_f, gamma_f = mu_U, gamma_U
    elif mode == "standard":
        mu_f = mu_U
        gamma_f = gamma_U + jnp.abs(b_noise)[None, :]
    elif mode == "sampling":
        eps = jnp.tan(jnp.pi * (uniform - 0.5))
        mu_f = mu_U + b_noise[None, :] * eps
        gamma_f = gamma_U
    mu_S = jnp.matmul(mu_f, weight.T, precision=hi) + bias
    if mode == "deterministic":
        return mu_S
    gamma_S = jnp.matmul(gamma_f, jnp.abs(weight).T, precision=hi)
    return mu_S, gamma_S


if __name__ == "__main__":
    batch, causal_size, output_size = 8, 32, 16

    key = jax.random.PRNGKey(0)
    k_mu, k_gamma, k_w, k_u = jax.random.split(key, 4)

    mu_U = jax.random.normal(k_mu, (batch, causal_size), dtype=jnp.float32)
    gamma_U = jnp.abs(jax.random.normal(k_gamma, (batch, causal_size),
                                        dtype=jnp.float32))

    # Deterministic parameter init (mirrors __init__):
    # weight: xavier_uniform_, bias: zeros, b_noise: full(0.1)
    bound = math.sqrt(6.0 / (causal_size + output_size))
    weight = jax.random.uniform(k_w, (output_size, causal_size),
                                minval=-bound, maxval=bound, dtype=jnp.float32)
    bias = jnp.zeros((output_size,), dtype=jnp.float32)
    b_noise = jnp.full((causal_size,), 0.1, dtype=jnp.float32)

    uniform = jax.random.uniform(k_u, (batch, causal_size), dtype=jnp.float32,
                                 minval=1e-3, maxval=1.0 - 1e-3)

    # ---- f32 MXU path: all five modes, tight tolerance --------------------
    for m in ("deterministic", "exogenous", "endogenous", "standard", "sampling"):
        u = uniform if m == "sampling" else None
        out = action_forward(mu_U, gamma_U, weight, bias, b_noise, mode=m, uniform=u)
        jax.block_until_ready(out)
        ref = _reference_forward(mu_U, gamma_U, weight, bias, b_noise, m, u)
        if m == "deterministic":
            assert out.shape == (batch, output_size)
            assert jnp.allclose(out, ref, atol=1e-5, rtol=1e-5), m
        else:
            tol_mu = 1e-4 if m == "sampling" else 1e-5
            assert out[0].shape == (batch, output_size)
            assert jnp.allclose(out[0], ref[0], atol=tol_mu, rtol=tol_mu), m
            assert jnp.allclose(out[1], ref[1], atol=1e-5, rtol=1e-5), m

    # ---- bf16 MXU fast path (v6e / v7x), f32 accumulate, looser tolerance -
    mu_b, gamma_b = action_forward(mu_U, gamma_U, weight, bias, b_noise,
                                   mode="standard", use_bf16_matmul=True)
    jax.block_until_ready((mu_b, gamma_b))
    r_mu, r_gamma = _reference_forward(mu_U, gamma_U, weight, bias, b_noise, "standard")
    assert jnp.allclose(mu_b, r_mu, atol=5e-2, rtol=5e-2)
    assert jnp.allclose(gamma_b, r_gamma, atol=5e-2, rtol=5e-2)

    # ---- larger, awkward shapes: multi-step batch grid + partial last block
    B2, C2, O2 = 1037, 96, 40
    kb = jax.random.split(jax.random.PRNGKey(1), 3)
    mu2 = jax.random.normal(kb[0], (B2, C2), dtype=jnp.float32)
    gamma2 = jnp.abs(jax.random.normal(kb[1], (B2, C2), dtype=jnp.float32))
    w2 = jax.random.uniform(kb[2], (O2, C2), minval=-0.2, maxval=0.2,
                            dtype=jnp.float32)
    bias2 = jnp.linspace(-1.0, 1.0, O2, dtype=jnp.float32)
    bn2 = jnp.full((C2,), 0.05, dtype=jnp.float32)
    mu_S2, gamma_S2 = action_forward(mu2, gamma2, w2, bias2, bn2, mode="standard")
    jax.block_until_ready((mu_S2, gamma_S2))
    r2_mu, r2_gamma = _reference_forward(mu2, gamma2, w2, bias2, bn2, "standard")
    assert mu_S2.shape == (B2, O2) and gamma_S2.shape == (B2, O2)
    assert jnp.allclose(mu_S2, r2_mu, atol=1e-4, rtol=1e-4)
    assert jnp.allclose(gamma_S2, r2_gamma, atol=1e-4, rtol=1e-4)

    print("KERNEL_OK")
</pallas_src>

<mosaic_0001>
module attributes {stable_mosaic.version = 11 : i64} {
  func.func @kernel(%arg0: i32, %arg1: memref<8x32xf32, #tpu.memory_space<vmem>>, %arg2: memref<32x16xf32, #tpu.memory_space<vmem>>, %arg3: memref<1x16xf32, #tpu.memory_space<vmem>>, %arg4: memref<8x16xf32, #tpu.memory_space<vmem>>) attributes {dimension_semantics = [#tpu.dimension_semantics<parallel>], iteration_bounds = array<i64: 1>, scalar_prefetch = 0 : i64, scratch_operands = 0 : i64, tpu.core_type = #tpu.core_type<tc>, window_params = [{transform_indices = @transform_0, window_bounds = array<i64: 8, 32>}, {pipeline_mode = #tpu.pipeline_mode<synchronous>, transform_indices = @transform_1, window_bounds = array<i64: 32, 16>}, {pipeline_mode = #tpu.pipeline_mode<synchronous>, transform_indices = @transform_2, window_bounds = array<i64: 1, 16>}, {transform_indices = @transform_3, window_bounds = array<i64: 8, 16>}]} {
    %c0 = arith.constant 0 : index
    %c0_0 = arith.constant 0 : index
    %0 = vector.load %arg1[%c0, %c0_0] : memref<8x32xf32, #tpu.memory_space<vmem>>, vector<8x32xf32>
    %c0_1 = arith.constant 0 : index
    %c0_2 = arith.constant 0 : index
    %1 = vector.load %arg2[%c0_1, %c0_2] : memref<32x16xf32, #tpu.memory_space<vmem>>, vector<32x16xf32>
    %cst = arith.constant dense<0.000000e+00> : vector<8x16xf32>
    %2 = tpu.matmul %0, %1, %cst {dimension_numbers = #tpu.dot_dimension_numbers<[1], [0], [0], [1], [0, 0, 1, 1], [], []>} : vector<8x32xf32>, vector<32x16xf32>, vector<8x16xf32> -> vector<8x16xf32>
    %c0_3 = arith.constant 0 : index
    %c0_4 = arith.constant 0 : index
    %3 = vector.load %arg3[%c0_3, %c0_4] : memref<1x16xf32, #tpu.memory_space<vmem>>, vector<1x16xf32>
    %4 = vector.broadcast %3 : vector<1x16xf32> to vector<8x16xf32>
    %5 = arith.addf %2, %4 : vector<8x16xf32>
    %c0_5 = arith.constant 0 : index
    %c0_6 = arith.constant 0 : index
    %6 = vector.load %arg4[%c0_5, %c0_6] : memref<8x16xf32, #tpu.memory_space<vmem>>, vector<8x16xf32>
    tpu.vector_store %arg4[%c0_5, %c0_6], %5 {strides = array<i32>} : memref<8x16xf32, #tpu.memory_space<vmem>>, vector<8x16xf32>,
    return
  }
  func.func @transform_0(%arg0: i32) -> (i32, i32) {
    %c0_i32 = arith.constant 0 : i32
    %c0_i32_0 = arith.constant 0 : i32
    return %arg0, %c0_i32 : i32, i32
  }
  func.func @transform_1(%arg0: i32) -> (i32, i32) {
    %c0_i32 = arith.constant 0 : i32
    %c0_i32_0 = arith.constant 0 : i32
    %c0_i32_1 = arith.constant 0 : i32
    return %c0_i32, %c0_i32_0 : i32, i32
  }
  func.func @transform_2(%arg0: i32) -> (i32, i32) {
    %c0_i32 = arith.constant 0 : i32
    %c0_i32_0 = arith.constant 0 : i32
    %c0_i32_1 = arith.constant 0 : i32
    return %c0_i32, %c0_i32_0 : i32, i32
  }
  func.func @transform_3(%arg0: i32) -> (i32, i32) {
    %c0_i32 = arith.constant 0 : i32
    %c0_i32_0 = arith.constant 0 : i32
    return %arg0, %c0_i32 : i32, i32
  }
}

</mosaic_0001>

<bundles_post_ra>
// kernel: action_forward.1
= control target key start
LH: loop header
LB: loop body
LE: loop exit
PB: predicated region body
PF: predicated region fallthrough
CT: control target
= control target key end

     0   :  { %s137_s0 = inlined_call_operand.vmem [shape: f32[8,32], index: 0, kind: input, shape index: {}]   ;;  %s138_s1 = inlined_call_operand.vmem [shape: f32[32,16], index: 1, kind: input, shape index: {}]   ;;  %s139_s2 = inlined_call_operand.vmem [shape: f32[1,16], index: 2, kind: input, shape index: {}]   ;;  %s140_s3 = inlined_call_operand.hbm [shape: f32[8,16], index: 3, kind: output, shape index: {}]  }
   0x1   :  { %v19_v0 = vld [vmem:[%s138_s1 + $0x18] sm:$0xff]  ;;  %v18_v1 = vld [vmem:[%s138_s1 + $0x10] sm:$0xff]  ;;  %v17_v2 = vld [vmem:[%s138_s1 + $0x8] sm:$0xff] }
   0x2   :  { %40 = vmatpush.msra.mxu0 %v19_v0 }
   0x3   :  { %8 = vsyncpa [#allocation3], 0  ;;  %v16_v3 = vld [vmem:[%s138_s1] sm:$0xff]  ;;  %vm24_vm0 = vcmask 261120   ;;  %s95_s24 = smov [#allocation2]   ;;  %s57_s28 = sshll.u32 %s140_s3, 4  ;;  %s58_s28 = int_to_ptr.hbm [resolvable:$true] %s57_s28 }
   0x4   :  { %41 = vmatpush.msra.mxu0 %v18_v1  ;;  %v15_v4 = vld [vmem:[%s137_s0] sm:$0xff]  ;;  %s55_s25 = sshll.u32 %s95_s24, 4  ;;  %vm48_vm1 = vcmask 130048   ;;  %s56_s25 = int_to_ptr.vmem [resolvable:$true] %s55_s25 }
   0x5   :  { %v68_v5 = vld [vmem:[%s139_s2] ss:$0 sm:$0xff] }
   0x6   :  { %42 = vmatpush.msra.mxu0 %v17_v2 }
   0x8   :  { %43 = vmatpush.msra.mxu0 %v16_v3 }
   0x9   :  { %66 = vmatmul.msk.f32.vlgmr.msra.gmra.mxu0 %vm24_vm0, %v15_v4 }
  0x86   :  { %v45_v6 = vpop.f32.mrf.mxu0 }
  0x87   :  { %v46_v7 = vadd.f32 %v68_v5, %v45_v6 }
  0x89   :  { %49 = vst.msk [vmem:[#allocation2] sm:$0xff] %vm48_vm1, %v46_v7 }
  0x8a   :  { %60 = dma.vmem_to_hbm [thread:$0]  %s56_s25, 128, %s58_s28, [#allocation3]  }
  0x8b   :  { %93 = dma.done.wait [#allocation3], 128  }
  0x8c   :  { %94 = vsyncadd [#allocation3], 4294967168 }
  0x8d   :  { %65 = vsyncpa [#allocation3], 1 }

</bundles_post_ra>
